<compile_context>
chip_gen: v7x
topology: tpu7x:2x2x1
jax: 0.10.0
libtpu: 0.0.40
codegen_flags: <defaults>
</compile_context>

<pallas_src>
from collections import OrderedDict

import jax
import jax.numpy as jnp
from jax.experimental import pallas as pl
from jax.experimental.pallas import tpu as pltpu

DB_K = 50.0        # DB step-function steepness
BCE_ALPHA = 5.0    # DBLoss weights (PP-OCR / DBNet defaults)
L1_BETA = 10.0
EPS = 1e-6


def _round_up(x, m):
    return (x + m - 1) // m * m


# ----------------------------------------------------------------------------
# Pallas kernels
# ----------------------------------------------------------------------------
def _db_head(patches_ref, w1t_ref, b1_ref, wht_ref, bh_ref):
    """Shared DB head. Pixels live in the lane dim throughout."""
    # hidden (Cmid, TN) = W1t(Cmid, Kp) @ patches(Kp, TN)   -- MXU, bf16 in,
    # f32 accumulate.
    h = jnp.dot(w1t_ref[...], patches_ref[...],
                preferred_element_type=jnp.float32)
    h = jnp.maximum(h + b1_ref[...], 0.0)                   # (Cmid, TN)

    # heads (8, TN): rows 0/1 are the prob / threshold logits (rows 2..7 pad).
    heads = jnp.dot(wht_ref[...], h,
                    preferred_element_type=jnp.float32) + bh_ref[...]
    prob = jax.nn.sigmoid(heads[0:1, :])                    # (1, TN) lane-dense
    thr = jax.nn.sigmoid(heads[1:2, :])
    binm = jax.nn.sigmoid(DB_K * (prob - thr))              # diff. binarization
    return prob, thr, binm


def _db_eval_kernel(patches_ref, w1t_ref, b1_ref, wht_ref, bh_ref,
                    prob_ref, thr_ref, bin_ref):
    prob, thr, binm = _db_head(patches_ref, w1t_ref, b1_ref, wht_ref, bh_ref)
    prob_ref[...] = prob
    thr_ref[...] = thr
    bin_ref[...] = binm


def _db_train_kernel(patches_ref, w1t_ref, b1_ref, wht_ref, bh_ref,
                     gs_ref, sm_ref, gt_ref, tm_ref,
                     prob_ref, thr_ref, bin_ref, part_ref):
    """Fused: DB head + per-tile loss partial sums (no HBM round trip)."""
    prob, thr, binm = _db_head(patches_ref, w1t_ref, b1_ref, wht_ref, bh_ref)
    prob_ref[...] = prob
    thr_ref[...] = thr
    bin_ref[...] = binm

    gs = gs_ref[...]          # gt shrink map        (1, TN)
    sm = sm_ref[...]          # shrink mask          (zero in the padded tail)
    gt = gt_ref[...]          # gt threshold map
    tm = tm_ref[...]          # threshold mask

    p = jnp.clip(prob, EPS, 1.0 - EPS)
    bce_elem = -(gs * jnp.log(p) + (1.0 - gs) * jnp.log(1.0 - p))

    def s(x):                 # (1, TN) -> (1, 1) partial sum
        return jnp.sum(x, keepdims=True)

    # 7 partial sums (+1 pad) for this tile:
    #   [bce_num, sm_sum, l1_num, tm_sum, dice_inter, bin*sm, gs*sm, 0]
    parts = jnp.concatenate(
        [s(bce_elem * sm), s(sm),
         s(jnp.abs(thr - gt) * tm), s(tm),
         s(binm * gs * sm), s(binm * sm), s(gs * sm),
         jnp.zeros((1, 1), jnp.float32)], axis=0)            # (8, 1)
    # Broadcast across lanes so the store block is a dense (8, 128) slab.
    part_ref[...] = jnp.broadcast_to(parts, (8, 128))


# ----------------------------------------------------------------------------
# JAX glue (layout plumbing)
# ----------------------------------------------------------------------------
def _im2col_t(img_nchw, kp, n_pad):
    """3x3 neighbourhoods (pad=1), transposed: (Kp, N_pad) bf16, row=tap*C+c."""
    B, C, H, W = img_nchw.shape
    x = jnp.transpose(img_nchw, (0, 2, 3, 1)).astype(jnp.float32)   # NHWC
    xp = jnp.pad(x, ((0, 0), (1, 1), (1, 1), (0, 0)))
    taps = [xp[:, dh:dh + H, dw:dw + W, :] for dh in range(3) for dw in range(3)]
    pat = jnp.stack(taps, axis=0)                   # (9, B, H, W, C)
    pat = jnp.transpose(pat, (0, 4, 1, 2, 3))       # (9, C, B, H, W)
    pat = pat.reshape(9 * C, B * H * W)             # (K, N)
    pat = jnp.pad(pat, ((0, kp - 9 * C), (0, n_pad - B * H * W)))
    return pat.astype(jnp.bfloat16)                 # bf16 for the HBM stream


def _flat_row(x_b1hw, n_pad):
    """(B,1,H,W) -> lane-dense (1, n_pad) f32 row (zero-padded tail)."""
    B, _, H, W = x_b1hw.shape
    v = x_b1hw.reshape(B * H * W).astype(jnp.float32)
    v = jnp.pad(v, (0, n_pad - B * H * W))
    return v.reshape(1, n_pad)


def _pack_pred(prob, thr, binm, B, H, W):
    def to_map(row):
        return row[0, :B * H * W].reshape(B, H, W)[:, None, :, :]   # NCHW
    pred = OrderedDict()
    pred["shrink_maps"] = to_map(prob)
    pred["threshold_maps"] = to_map(thr)
    pred["binary_maps"] = to_map(binm)
    return pred


def loss_model_forward(batch, params, training=True, tile_lanes=2048):
    """Mirror of LossModel.forward."""
    img = batch["img"]
    B, C, H, W = img.shape
    n = B * H * W
    c_mid, kp = params["w1t"].shape

    # pixel tiling: TN lanes per grid step (multiple of 128)
    tn = max(128, min(_round_up(tile_lanes, 128), _round_up(n, 128)))
    n_pad = _round_up(n, tn)
    num_tiles = n_pad // tn

    patches_t = _im2col_t(img, kp, n_pad)           # (kp, n_pad) bf16

    row_spec = pl.BlockSpec((1, tn), lambda i: (0, i))

    def const_spec(shape):                          # weights stay resident
        return pl.BlockSpec(shape, lambda i: (0, 0))

    common_in_specs = [
        pl.BlockSpec((kp, tn), lambda i: (0, i)),   # patches tile
        const_spec((c_mid, kp)),                    # W1^T (bf16)
        const_spec((c_mid, 1)),                     # b1
        const_spec((8, c_mid)),                     # head weights (rows 0/1)
        const_spec((8, 1)),                         # head bias
    ]
    map_shape = jax.ShapeDtypeStruct((1, n_pad), jnp.float32)
    cparams = pltpu.CompilerParams(
        dimension_semantics=("parallel",),          # tiles are independent
        vmem_limit_bytes=32 * 1024 * 1024)          # safe on v5e/v6e/v7x

    weights = (params["w1t"], params["b1"], params["wht"], params["bh"])

    if not training:
        prob, thr, binm = pl.pallas_call(
            _db_eval_kernel,
            grid=(num_tiles,),
            in_specs=common_in_specs,
            out_specs=(row_spec,) * 3,
            out_shape=(map_shape,) * 3,
            compiler_params=cparams,
        )(patches_t, *weights)
        return _pack_pred(prob, thr, binm, B, H, W)

    gs = _flat_row(batch["shrink_map"], n_pad)
    sm = _flat_row(batch["shrink_mask"], n_pad)
    gt = _flat_row(batch["threshold_map"], n_pad)
    tm = _flat_row(batch["threshold_mask"], n_pad)

    prob, thr, binm, partials = pl.pallas_call(
        _db_train_kernel,
        grid=(num_tiles,),
        in_specs=common_in_specs + [row_spec] * 4,
        out_specs=(row_spec,) * 3 + (
            pl.BlockSpec((8, 128), lambda i: (i, 0)),),
        out_shape=(map_shape,) * 3 + (
            jax.ShapeDtypeStruct((num_tiles * 8, 128), jnp.float32),),
        compiler_params=cparams,
    )(patches_t, *weights, gs, sm, gt, tm)

    pred = _pack_pred(prob, thr, binm, B, H, W)

    # tiny cross-tile combine in XLA (keeps the grid axis 'parallel')
    p = partials.reshape(num_tiles, 8, 128)[:, :, 0].sum(axis=0)
    bce = p[0] / (p[1] + EPS)
    l1 = p[2] / (p[3] + EPS)
    dice = 1.0 - 2.0 * p[4] / (p[5] + p[6] + EPS)
    loss = BCE_ALPHA * bce + L1_BETA * l1 + dice
    metric = OrderedDict(loss_total=loss, loss_bce=bce,
                         loss_l1=l1, loss_dice=dice)
    return pred, loss, metric


# ----------------------------------------------------------------------------
# parameters / pure-JAX reference (for a sanity check)
# ----------------------------------------------------------------------------
def init_params(key, c_in=4, c_mid=32):
    kp = _round_up(9 * c_in, 8)
    k1, k2, k3, k4 = jax.random.split(key, 4)
    w1 = jax.random.normal(k1, (c_mid, 9 * c_in), jnp.float32) / (9 * c_in) ** 0.5
    w1t = jnp.pad(w1, ((0, 0), (0, kp - 9 * c_in))).astype(jnp.bfloat16)
    b1 = 0.1 * jax.random.normal(k3, (c_mid, 1), jnp.float32)
    wh = jax.random.normal(k2, (2, c_mid), jnp.float32) / c_mid ** 0.5
    wht = jnp.pad(wh, ((0, 6), (0, 0)))             # (8, c_mid), rows 0/1 live
    bh = jnp.pad(0.1 * jax.random.normal(k4, (2, 1), jnp.float32),
                 ((0, 6), (0, 0)))
    return dict(w1t=w1t, b1=b1, wht=wht, bh=bh)


def _reference_loss(patches_t, params, gs, sm, gt, tm):
    """Pure-JAX reference of the fused kernel math (same bf16 inputs)."""
    pat = patches_t.astype(jnp.float32)
    w1 = params["w1t"].astype(jnp.float32)
    h = jnp.maximum(w1 @ pat + params["b1"], 0.0)
    heads = params["wht"] @ h + params["bh"]
    prob = jax.nn.sigmoid(heads[0:1, :])
    thr = jax.nn.sigmoid(heads[1:2, :])
    binm = jax.nn.sigmoid(DB_K * (prob - thr))
    p = jnp.clip(prob, EPS, 1.0 - EPS)
    bce = jnp.sum(-(gs * jnp.log(p) + (1.0 - gs) * jnp.log(1.0 - p)) * sm) \
        / (jnp.sum(sm) + EPS)
    l1 = jnp.sum(jnp.abs(thr - gt) * tm) / (jnp.sum(tm) + EPS)
    inter = jnp.sum(binm * gs * sm)
    union = jnp.sum(binm * sm) + jnp.sum(gs * sm) + EPS
    dice = 1.0 - 2.0 * inter / union
    return BCE_ALPHA * bce + L1_BETA * l1 + dice


if __name__ == "__main__":
    key = jax.random.PRNGKey(0)
    kimg, kgt, kthr, kparam = jax.random.split(key, 4)

    B, C, H, W = 2, 4, 16, 16
    img = jax.random.normal(kimg, (B, C, H, W), jnp.float32)

    # synthetic DB ground truth
    shrink_map = (jax.random.uniform(kgt, (B, 1, H, W)) > 0.7).astype(jnp.float32)
    shrink_mask = jnp.ones((B, 1, H, W), jnp.float32)
    threshold_map = 0.3 + 0.4 * jax.random.uniform(kthr, (B, 1, H, W))
    threshold_mask = jnp.ones((B, 1, H, W), jnp.float32)

    batch = OrderedDict(
        img=img,
        shrink_map=shrink_map,
        shrink_mask=shrink_mask,
        threshold_map=threshold_map,
        threshold_mask=threshold_mask,
    )

    params = init_params(kparam, c_in=C, c_mid=32)

    # training path: tile_lanes=384 -> N=512 pixels padded to 768, grid=(2,)
    # (exercises multi-tile pipelining, the parallel partial sums and the
    # zero-padded tail).
    pred, loss, metric = loss_model_forward(batch, params, training=True,
                                            tile_lanes=384)
    jax.block_until_ready(loss)
    jax.block_until_ready(pred["binary_maps"])

    # inference path (training=False)
    pred_only = loss_model_forward(batch, params, training=False,
                                   tile_lanes=384)
    jax.block_until_ready(pred_only["shrink_maps"])

    # checks
    assert pred["shrink_maps"].shape == (B, 1, H, W)
    assert pred_only["binary_maps"].shape == (B, 1, H, W)
    assert bool(jnp.isfinite(loss))

    n = B * H * W
    kp_dim = params["w1t"].shape[1]
    ref = _reference_loss(
        _im2col_t(img, kp_dim, n), params,
        _flat_row(shrink_map, n), _flat_row(shrink_mask, n),
        _flat_row(threshold_map, n), _flat_row(threshold_mask, n))
    assert bool(jnp.allclose(loss, ref, rtol=2e-2, atol=2e-2)), (loss, ref)
    assert bool(jnp.allclose(pred["shrink_maps"], pred_only["shrink_maps"],
                             atol=1e-5))

    print("KERNEL_OK")
</pallas_src>

<mosaic_0001>
module attributes {stable_mosaic.version = 11 : i64} {
  func.func @_db_train_kernel(%arg0: i32, %arg1: memref<40x384xbf16, #tpu.memory_space<vmem>>, %arg2: memref<32x40xbf16, #tpu.memory_space<vmem>>, %arg3: memref<32x1xf32, #tpu.memory_space<vmem>>, %arg4: memref<8x32xf32, #tpu.memory_space<vmem>>, %arg5: memref<8x1xf32, #tpu.memory_space<vmem>>, %arg6: memref<1x384xf32, #tpu.memory_space<vmem>>, %arg7: memref<1x384xf32, #tpu.memory_space<vmem>>, %arg8: memref<1x384xf32, #tpu.memory_space<vmem>>, %arg9: memref<1x384xf32, #tpu.memory_space<vmem>>, %arg10: memref<1x384xf32, #tpu.memory_space<vmem>>, %arg11: memref<1x384xf32, #tpu.memory_space<vmem>>, %arg12: memref<1x384xf32, #tpu.memory_space<vmem>>, %arg13: memref<8x128xf32, #tpu.memory_space<vmem>>) attributes {dimension_semantics = [#tpu.dimension_semantics<parallel>], iteration_bounds = array<i64: 2>, scalar_prefetch = 0 : i64, scratch_operands = 0 : i64, tpu.core_type = #tpu.core_type<tc>, window_params = [{transform_indices = @transform_0, window_bounds = array<i64: 40, 384>}, {pipeline_mode = #tpu.pipeline_mode<synchronous>, transform_indices = @transform_1, window_bounds = array<i64: 32, 40>}, {pipeline_mode = #tpu.pipeline_mode<synchronous>, transform_indices = @transform_2, window_bounds = array<i64: 32, 1>}, {pipeline_mode = #tpu.pipeline_mode<synchronous>, transform_indices = @transform_3, window_bounds = array<i64: 8, 32>}, {pipeline_mode = #tpu.pipeline_mode<synchronous>, transform_indices = @transform_4, window_bounds = array<i64: 8, 1>}, {transform_indices = @transform_5, window_bounds = array<i64: 1, 384>}, {transform_indices = @transform_6, window_bounds = array<i64: 1, 384>}, {transform_indices = @transform_7, window_bounds = array<i64: 1, 384>}, {transform_indices = @transform_8, window_bounds = array<i64: 1, 384>}, {transform_indices = @transform_9, window_bounds = array<i64: 1, 384>}, {transform_indices = @transform_10, window_bounds = array<i64: 1, 384>}, {transform_indices = @transform_11, window_bounds = array<i64: 1, 384>}, {transform_indices = @transform_12, window_bounds = array<i64: 8, 128>}]} {
    %c0 = arith.constant 0 : index
    %c0_0 = arith.constant 0 : index
    %0 = vector.load %arg2[%c0, %c0_0] : memref<32x40xbf16, #tpu.memory_space<vmem>>, vector<32x40xbf16>
    %c0_1 = arith.constant 0 : index
    %c0_2 = arith.constant 0 : index
    %1 = vector.load %arg1[%c0_1, %c0_2] : memref<40x384xbf16, #tpu.memory_space<vmem>>, vector<40x384xbf16>
    %cst = arith.constant dense<0.000000e+00> : vector<32x384xf32>
    %2 = tpu.matmul %0, %1, %cst {dimension_numbers = #tpu.dot_dimension_numbers<[1], [0], [0], [1], [0, 0, 1, 1], [], []>} : vector<32x40xbf16>, vector<40x384xbf16>, vector<32x384xf32> -> vector<32x384xf32>
    %c0_3 = arith.constant 0 : index
    %c0_4 = arith.constant 0 : index
    %3 = vector.load %arg3[%c0_3, %c0_4] : memref<32x1xf32, #tpu.memory_space<vmem>>, vector<32x1xf32>
    %4 = vector.broadcast %3 : vector<32x1xf32> to vector<32x384xf32>
    %5 = arith.addf %2, %4 : vector<32x384xf32>
    %cst_5 = arith.constant 0.000000e+00 : f32
    %6 = vector.broadcast %cst_5 : f32 to vector<32x384xf32>
    %7 = arith.maximumf %5, %6 : vector<32x384xf32>
    %c0_6 = arith.constant 0 : index
    %c0_7 = arith.constant 0 : index
    %8 = vector.load %arg4[%c0_6, %c0_7] : memref<8x32xf32, #tpu.memory_space<vmem>>, vector<8x32xf32>
    %cst_8 = arith.constant dense<0.000000e+00> : vector<8x384xf32>
    %9 = tpu.matmul %8, %7, %cst_8 {dimension_numbers = #tpu.dot_dimension_numbers<[1], [0], [0], [1], [0, 0, 1, 1], [], []>} : vector<8x32xf32>, vector<32x384xf32>, vector<8x384xf32> -> vector<8x384xf32>
    %c0_9 = arith.constant 0 : index
    %c0_10 = arith.constant 0 : index
    %10 = vector.load %arg5[%c0_9, %c0_10] : memref<8x1xf32, #tpu.memory_space<vmem>>, vector<8x1xf32>
    %11 = vector.broadcast %10 : vector<8x1xf32> to vector<8x384xf32>
    %12 = arith.addf %9, %11 : vector<8x384xf32>
    %13 = vector.extract_strided_slice %12 {offsets = [0, 0], sizes = [1, 384], strides = [1, 1]} : vector<8x384xf32> to vector<1x384xf32>
    %14 = arith.negf %13 : vector<1x384xf32>
    %15 = math.exp %14 : vector<1x384xf32>
    %cst_11 = arith.constant 1.000000e+00 : f32
    %16 = vector.broadcast %cst_11 : f32 to vector<1x384xf32>
    %17 = arith.addf %16, %15 : vector<1x384xf32>
    %18 = arith.divf %16, %17 : vector<1x384xf32>
    %19 = vector.extract_strided_slice %12 {offsets = [1, 0], sizes = [1, 384], strides = [1, 1]} : vector<8x384xf32> to vector<1x384xf32>
    %20 = arith.negf %19 : vector<1x384xf32>
    %21 = math.exp %20 : vector<1x384xf32>
    %cst_12 = arith.constant 1.000000e+00 : f32
    %22 = vector.broadcast %cst_12 : f32 to vector<1x384xf32>
    %23 = arith.addf %22, %21 : vector<1x384xf32>
    %24 = arith.divf %22, %23 : vector<1x384xf32>
    %25 = arith.subf %18, %24 : vector<1x384xf32>
    %cst_13 = arith.constant 5.000000e+01 : f32
    %26 = vector.broadcast %cst_13 : f32 to vector<1x384xf32>
    %27 = arith.mulf %26, %25 : vector<1x384xf32>
    %28 = arith.negf %27 : vector<1x384xf32>
    %29 = math.exp %28 : vector<1x384xf32>
    %cst_14 = arith.constant 1.000000e+00 : f32
    %30 = vector.broadcast %cst_14 : f32 to vector<1x384xf32>
    %31 = arith.addf %30, %29 : vector<1x384xf32>
    %32 = arith.divf %30, %31 : vector<1x384xf32>
    %c0_15 = arith.constant 0 : index
    %c0_16 = arith.constant 0 : index
    %33 = vector.load %arg10[%c0_15, %c0_16] : memref<1x384xf32, #tpu.memory_space<vmem>>, vector<1x384xf32>
    tpu.vector_store %arg10[%c0_15, %c0_16], %18 {strides = array<i32>} : memref<1x384xf32, #tpu.memory_space<vmem>>, vector<1x384xf32>,
    %c0_17 = arith.constant 0 : index
    %c0_18 = arith.constant 0 : index
    %34 = vector.load %arg11[%c0_17, %c0_18] : memref<1x384xf32, #tpu.memory_space<vmem>>, vector<1x384xf32>
    tpu.vector_store %arg11[%c0_17, %c0_18], %24 {strides = array<i32>} : memref<1x384xf32, #tpu.memory_space<vmem>>, vector<1x384xf32>,
    %c0_19 = arith.constant 0 : index
    %c0_20 = arith.constant 0 : index
    %35 = vector.load %arg12[%c0_19, %c0_20] : memref<1x384xf32, #tpu.memory_space<vmem>>, vector<1x384xf32>
    tpu.vector_store %arg12[%c0_19, %c0_20], %32 {strides = array<i32>} : memref<1x384xf32, #tpu.memory_space<vmem>>, vector<1x384xf32>,
    %c0_21 = arith.constant 0 : index
    %c0_22 = arith.constant 0 : index
    %36 = vector.load %arg6[%c0_21, %c0_22] : memref<1x384xf32, #tpu.memory_space<vmem>>, vector<1x384xf32>
    %c0_23 = arith.constant 0 : index
    %c0_24 = arith.constant 0 : index
    %37 = vector.load %arg7[%c0_23, %c0_24] : memref<1x384xf32, #tpu.memory_space<vmem>>, vector<1x384xf32>
    %c0_25 = arith.constant 0 : index
    %c0_26 = arith.constant 0 : index
    %38 = vector.load %arg8[%c0_25, %c0_26] : memref<1x384xf32, #tpu.memory_space<vmem>>, vector<1x384xf32>
    %c0_27 = arith.constant 0 : index
    %c0_28 = arith.constant 0 : index
    %39 = vector.load %arg9[%c0_27, %c0_28] : memref<1x384xf32, #tpu.memory_space<vmem>>, vector<1x384xf32>
    %cst_29 = arith.constant 9.99999997E-7 : f32
    %cst_30 = arith.constant 0.999998986 : f32
    %40 = vector.broadcast %cst_29 : f32 to vector<1x384xf32>
    %41 = arith.maximumf %40, %18 : vector<1x384xf32>
    %42 = vector.broadcast %cst_30 : f32 to vector<1x384xf32>
    %43 = arith.minimumf %42, %41 : vector<1x384xf32>
    %44 = math.log %43 : vector<1x384xf32>
    %45 = arith.mulf %36, %44 : vector<1x384xf32>
    %cst_31 = arith.constant 1.000000e+00 : f32
    %46 = vector.broadcast %cst_31 : f32 to vector<1x384xf32>
    %47 = arith.subf %46, %36 : vector<1x384xf32>
    %cst_32 = arith.constant 1.000000e+00 : f32
    %48 = vector.broadcast %cst_32 : f32 to vector<1x384xf32>
    %49 = arith.subf %48, %43 : vector<1x384xf32>
    %50 = math.log %49 : vector<1x384xf32>
    %51 = arith.mulf %47, %50 : vector<1x384xf32>
    %52 = arith.addf %45, %51 : vector<1x384xf32>
    %cst_33 = arith.constant 0.000000e+00 : f32
    %53 = vector.broadcast %cst_33 : f32 to vector<1x384xf32>
    %54 = arith.subf %53, %52 : vector<1x384xf32>
    %55 = arith.mulf %54, %37 : vector<1x384xf32>
    %56 = vector.shape_cast %55 : vector<1x384xf32> to vector<1x1x384xf32>
    %cst_34 = arith.constant dense<0.000000e+00> : vector<1xf32>
    %57 = vector.multi_reduction <add>, %56, %cst_34 [1, 2] : vector<1x1x384xf32> to vector<1xf32>
    %58 = vector.shape_cast %57 : vector<1xf32> to vector<1x1x1xf32>
    %59 = vector.extract %58[0, 0, 0] : f32 from vector<1x1x1xf32>
    %60 = vector.broadcast %59 : f32 to vector<1x1xf32>
    %61 = vector.shape_cast %37 : vector<1x384xf32> to vector<1x1x384xf32>
    %cst_35 = arith.constant dense<0.000000e+00> : vector<1xf32>
    %62 = vector.multi_reduction <add>, %61, %cst_35 [1, 2] : vector<1x1x384xf32> to vector<1xf32>
    %63 = vector.shape_cast %62 : vector<1xf32> to vector<1x1x1xf32>
    %64 = vector.extract %63[0, 0, 0] : f32 from vector<1x1x1xf32>
    %65 = vector.broadcast %64 : f32 to vector<1x1xf32>
    %66 = arith.subf %24, %38 : vector<1x384xf32>
    %67 = math.absf %66 : vector<1x384xf32>
    %68 = arith.mulf %67, %39 : vector<1x384xf32>
    %69 = vector.shape_cast %68 : vector<1x384xf32> to vector<1x1x384xf32>
    %cst_36 = arith.constant dense<0.000000e+00> : vector<1xf32>
    %70 = vector.multi_reduction <add>, %69, %cst_36 [1, 2] : vector<1x1x384xf32> to vector<1xf32>
    %71 = vector.shape_cast %70 : vector<1xf32> to vector<1x1x1xf32>
    %72 = vector.extract %71[0, 0, 0] : f32 from vector<1x1x1xf32>
    %73 = vector.broadcast %72 : f32 to vector<1x1xf32>
    %74 = vector.shape_cast %39 : vector<1x384xf32> to vector<1x1x384xf32>
    %cst_37 = arith.constant dense<0.000000e+00> : vector<1xf32>
    %75 = vector.multi_reduction <add>, %74, %cst_37 [1, 2] : vector<1x1x384xf32> to vector<1xf32>
    %76 = vector.shape_cast %75 : vector<1xf32> to vector<1x1x1xf32>
    %77 = vector.extract %76[0, 0, 0] : f32 from vector<1x1x1xf32>
    %78 = vector.broadcast %77 : f32 to vector<1x1xf32>
    %79 = arith.mulf %32, %36 : vector<1x384xf32>
    %80 = arith.mulf %79, %37 : vector<1x384xf32>
    %81 = vector.shape_cast %80 : vector<1x384xf32> to vector<1x1x384xf32>
    %cst_38 = arith.constant dense<0.000000e+00> : vector<1xf32>
    %82 = vector.multi_reduction <add>, %81, %cst_38 [1, 2] : vector<1x1x384xf32> to vector<1xf32>
    %83 = vector.shape_cast %82 : vector<1xf32> to vector<1x1x1xf32>
    %84 = vector.extract %83[0, 0, 0] : f32 from vector<1x1x1xf32>
    %85 = vector.broadcast %84 : f32 to vector<1x1xf32>
    %86 = arith.mulf %32, %37 : vector<1x384xf32>
    %87 = vector.shape_cast %86 : vector<1x384xf32> to vector<1x1x384xf32>
    %cst_39 = arith.constant dense<0.000000e+00> : vector<1xf32>
    %88 = vector.multi_reduction <add>, %87, %cst_39 [1, 2] : vector<1x1x384xf32> to vector<1xf32>
    %89 = vector.shape_cast %88 : vector<1xf32> to vector<1x1x1xf32>
    %90 = vector.extract %89[0, 0, 0] : f32 from vector<1x1x1xf32>
    %91 = vector.broadcast %90 : f32 to vector<1x1xf32>
    %92 = arith.mulf %36, %37 : vector<1x384xf32>
    %93 = vector.shape_cast %92 : vector<1x384xf32> to vector<1x1x384xf32>
    %cst_40 = arith.constant dense<0.000000e+00> : vector<1xf32>
    %94 = vector.multi_reduction <add>, %93, %cst_40 [1, 2] : vector<1x1x384xf32> to vector<1xf32>
    %95 = vector.shape_cast %94 : vector<1xf32> to vector<1x1x1xf32>
    %96 = vector.extract %95[0, 0, 0] : f32 from vector<1x1x1xf32>
    %97 = vector.broadcast %96 : f32 to vector<1x1xf32>
    %cst_41 = arith.constant 0.000000e+00 : f32
    %98 = vector.broadcast %cst_41 : f32 to vector<1x1xf32>
    %99 = tpu.concatenate %60, %65, %73, %78, %85, %91, %97, %98 in 0 : vector<1x1xf32>, vector<1x1xf32>, vector<1x1xf32>, vector<1x1xf32>, vector<1x1xf32>, vector<1x1xf32>, vector<1x1xf32>, vector<1x1xf32> -> vector<8x1xf32>
    %100 = vector.shape_cast %99 : vector<8x1xf32> to vector<8x1xf32>
    %101 = vector.broadcast %100 : vector<8x1xf32> to vector<8x128xf32>
    %c0_42 = arith.constant 0 : index
    %c0_43 = arith.constant 0 : index
    %102 = vector.load %arg13[%c0_42, %c0_43] : memref<8x128xf32, #tpu.memory_space<vmem>>, vector<8x128xf32>
    tpu.vector_store %arg13[%c0_42, %c0_43], %101 {strides = array<i32>} : memref<8x128xf32, #tpu.memory_space<vmem>>, vector<8x128xf32>,
    return
  }
  func.func @transform_0(%arg0: i32) -> (i32, i32) {
    %c0_i32 = arith.constant 0 : i32
    %c0_i32_0 = arith.constant 0 : i32
    return %c0_i32, %arg0 : i32, i32
  }
  func.func @transform_1(%arg0: i32) -> (i32, i32) {
    %c0_i32 = arith.constant 0 : i32
    %c0_i32_0 = arith.constant 0 : i32
    %c0_i32_1 = arith.constant 0 : i32
    return %c0_i32, %c0_i32_0 : i32, i32
  }
  func.func @transform_2(%arg0: i32) -> (i32, i32) {
    %c0_i32 = arith.constant 0 : i32
    %c0_i32_0 = arith.constant 0 : i32
    %c0_i32_1 = arith.constant 0 : i32
    return %c0_i32, %c0_i32_0 : i32, i32
  }
  func.func @transform_3(%arg0: i32) -> (i32, i32) {
    %c0_i32 = arith.constant 0 : i32
    %c0_i32_0 = arith.constant 0 : i32
    %c0_i32_1 = arith.constant 0 : i32
    return %c0_i32, %c0_i32_0 : i32, i32
  }
  func.func @transform_4(%arg0: i32) -> (i32, i32) {
    %c0_i32 = arith.constant 0 : i32
    %c0_i32_0 = arith.constant 0 : i32
    %c0_i32_1 = arith.constant 0 : i32
    return %c0_i32, %c0_i32_0 : i32, i32
  }
  func.func @transform_5(%arg0: i32) -> (i32, i32) {
    %c0_i32 = arith.constant 0 : i32
    %c0_i32_0 = arith.constant 0 : i32
    return %c0_i32, %arg0 : i32, i32
  }
  func.func @transform_6(%arg0: i32) -> (i32, i32) {
    %c0_i32 = arith.constant 0 : i32
    %c0_i32_0 = arith.constant 0 : i32
    return %c0_i32, %arg0 : i32, i32
  }
  func.func @transform_7(%arg0: i32) -> (i32, i32) {
    %c0_i32 = arith.constant 0 : i32
    %c0_i32_0 = arith.constant 0 : i32
    return %c0_i32, %arg0 : i32, i32
  }
  func.func @transform_8(%arg0: i32) -> (i32, i32) {
    %c0_i32 = arith.constant 0 : i32
    %c0_i32_0 = arith.constant 0 : i32
    return %c0_i32, %arg0 : i32, i32
  }
  func.func @transform_9(%arg0: i32) -> (i32, i32) {
    %c0_i32 = arith.constant 0 : i32
    %c0_i32_0 = arith.constant 0 : i32
    return %c0_i32, %arg0 : i32, i32
  }
  func.func @transform_10(%arg0: i32) -> (i32, i32) {
    %c0_i32 = arith.constant 0 : i32
    %c0_i32_0 = arith.constant 0 : i32
    return %c0_i32, %arg0 : i32, i32
  }
  func.func @transform_11(%arg0: i32) -> (i32, i32) {
    %c0_i32 = arith.constant 0 : i32
    %c0_i32_0 = arith.constant 0 : i32
    return %c0_i32, %arg0 : i32, i32
  }
  func.func @transform_12(%arg0: i32) -> (i32, i32) {
    %c0_i32 = arith.constant 0 : i32
    %c0_i32_0 = arith.constant 0 : i32
    return %arg0, %c0_i32 : i32, i32
  }
}

</mosaic_0001>

<bundles_post_ra>
// kernel: tpu_custom_call.1
= control target key start
LH: loop header
LB: loop body
LE: loop exit
PB: predicated region body
PF: predicated region fallthrough
CT: control target
= control target key end

     0   :  { %s2546_s0 = inlined_call_operand.hbm [shape: bf16[40,768], index: 0, kind: input, shape index: {}]   ;;  %s2547_s1 = inlined_call_operand.vmem [shape: bf16[32,40], index: 1, kind: input, shape index: {}]   ;;  %s2548_s2 = inlined_call_operand.vmem [shape: f32[32,1], index: 2, kind: input, shape index: {}]   ;;  %s2549_s3 = inlined_call_operand.vmem [shape: f32[8,32], index: 3, kind: input, shape index: {}]   ;;  %s2550_s4 = inlined_call_operand.vmem [shape: f32[8,1], index: 4, kind: input, shape index: {}]   ;;  %s2551_s5 = inlined_call_operand.vmem [shape: f32[1,768], index: 5, kind: input, shape index: {}]   ;;  %s2552_s6 = inlined_call_operand.vmem [shape: f32[1,768], index: 6, kind: input, shape index: {}]   ;;  %s2553_s7 = inlined_call_operand.vmem [shape: f32[1,768], index: 7, kind: input, shape index: {}]   ;;  %s2554_s8 = inlined_call_operand.vmem [shape: f32[1,768], index: 8, kind: input, shape index: {}]   ;;  %s2555_s9 = inlined_call_operand.hbm [shape: f32[1,768], index: 9, kind: output, shape index: {0}]   ;;  %s2556_s10 = inlined_call_operand.hbm [shape: f32[1,768], index: 10, kind: output, shape index: {1}]   ;;  %s2557_s11 = inlined_call_operand.hbm [shape: f32[1,768], index: 11, kind: output, shape index: {2}]   ;;  %s2558_s12 = inlined_call_operand.hbm [shape: f32[16,128], index: 12, kind: output, shape index: {3}]  }
   0x1   :  { %2567 = sst [smem:[#allocation19_spill]] %s2546_s0 }
   0x2   :  { %2568 = sst [smem:[#allocation20_spill]] %s2547_s1 }
   0x3   :  { %2569 = sst [smem:[#allocation21_spill]] %s2548_s2 }
   0x4   :  { %18 = vsyncpa [#allocation3], 0 }
   0x5   :  { %20 = vsyncpa [#allocation3 + $0x1], 0 }
   0x6   :  { %21 = vsyncpa [#allocation4], 0 }
   0x7   :  { %23 = vsyncpa [#allocation4 + $0x1], 0 }
   0x8   :  { %24 = vsyncpa [#allocation7], 0 }
   0x9   :  { %26 = vsyncpa [#allocation7 + $0x1], 0 }
   0xa   :  { %27 = vsyncpa [#allocation10], 0 }
   0xb   :  { %29 = vsyncpa [#allocation10 + $0x1], 0  ;;  %s2125_s21 = smov 0   ;;  %s2127_s22 = smov 0  }
   0xc   :  { %s2129_s23 = smov 0   ;;  %s2131_s24 = smov 0  }
   0xd LB: > { %2570 = sst [smem:[#allocation15_spill]] %s2041_s23  ;;  %s2146_s25 = sadd.s32 4294967295, %s2045_s24   ;;  %s2045_s24 = sphi %s2131_s24, %s2591_s24   ;;  %s2041_s23 = sphi %s2129_s23, %s2593_s23   ;;  %s2037_s22 = sphi %s2127_s22, %s2595_s22   ;;  %s2033_s21 = sphi %s2125_s21, %s2594_s21  }
   0xe   : > { %s2559_s26 = sadd.s32 4294967294, %s2045_s24   ;;  %s2150_s27 = sadd.s32 1, %s2045_s24  }
   0xf   : > { %2571 = sst [smem:[#allocation16_spill]] %s2150_s27  ;;  %s42_s28 = sadd.s32 1, %s2041_s23 }
  0x10   : > { %s39_s29 = ssub.s32 %s2045_s24, %s2150_s27  ;;  %p49_p0 = scmp.ne.s32.totalorder %s2041_s23, %s2037_s22 }
  0x11   : > { %p40_p1 = scmp.eq.s32.totalorder %s39_s29, 0  ;;  %p50_p2 = scmp.eq.s32.totalorder %s2045_s24, 0 }
  0x12   : > { %p55_p3 = scmp.ne.s32.totalorder %s2037_s22, %s2033_s21  ;;  %p56_p4 = scmp.eq.s32.totalorder %s2146_s25, 0 }
  0x13   : > { %s2162_s30 = scalar_select %p40_p1, %s2041_s23, %s42_s28  }
  0x14   : > { %p51_p5 = por %p50_p2, %p49_p0  ;;  %p2164_p6 = por %p56_p4, %p55_p3 }
  0x15   : > { %2572 = sst [smem:[#allocation17_spill]] %s2162_s30  ;;  %p267_p7 = scmp.eq.s32.totalorder %s2146_s25, 1 }
  0x16   : > { %p273_p8 = scmp.eq.s32.totalorder %s2559_s26, 1  ;;  %p1764_p10 = scmp.lt.s32.totalorder %s2045_s24, 2 }
  0x17   : > { %p2173_p11 = por %p267_p7, %p49_p0  ;;  %s383_s16 = sand.u32 1, %s2041_s23  }
  0x18   : > { %p2177_p12 = por %p273_p8, %p55_p3  ;;  %s1670_s17 = smul.u32 192, %s2045_s24 }
  0x19   : > { %s2574_s14 = scalar_select %p2173_p11, 1, 0 }
  0x1a   : > { %s2575_s15 = scalar_select %p2177_p12, 1, 0 }
  0x1b   : > { %s1720_s18 = smul.u32 60, %s383_s16  ;;  %s2577_s0 = sld [smem:[#allocation19_spill]] }
  0x1c   : > { %2576 = sst [smem:[#allocation18_spill]] %s2575_s15  ;;  %p2188_p13 = pnand %p1764_p10, %p51_p5 }
  0x1d   : > { %s387_s26 = scalar_lea.vmem [#allocation2], %s1720_s18  ;;  %s2195_s23 = scalar_lea.sflag [#allocation3], %s383_s16 }
  0x1e   : > { %s394_s30 = sshll.u32 %s387_s26, 4  ;;  %p1859_p2 = pneg %p2188_p13  ;;  %s2192_s30 = int_to_ptr.vmem [resolvable:$true] %s394_s30 }
  0x21   : > { %s2186_s28 = scalar_lea.hbm %s2577_s0, %s1670_s17  ;;  %s1862_s27 = scalar_lea.hbm %s2577_s0, 1920 }
  0x22   : > { %s1857_s19 = scalar_lea.hbm %s2186_s28, 960  ;;  %p1863_p5 = scmp.lt.u32.totalorder %s2186_s28, %s2577_s0 }
  0x23   : > { %p1858_p1 = scmp.ne.s32.totalorder %s2186_s28, %s1857_s19  ;;  %p1864_p7 = scmp.lt.u32.totalorder %s1862_s27, %s1857_s19 }
  0x24   : > { %p1866_p10 = scmp.lt.u32.totalorder %s1857_s19, %s2186_s28 }
  0x25   : > { %p1860_p3 = pnand %p1859_p2, %p1858_p1  ;;  %p1865_p8 = por %p1864_p7, %p1863_p5 }
  0x27   : > { %p1861_p4 = pneg %p1860_p3  ;;  %p1867_p9 = por %p1866_p10, %p1865_p8 }
  0x29   : > { %p1868_p0 = pnand %p1867_p9, %p1861_p4 }
  0x2b   : > { %1871 = shalt.err (!%p1868_p0)
}
  0x2c   : > { %s1872_s26 = scalar_lea.vmem %s2192_s30, 960  ;;  %s2047_s16 = smov [#allocation2]  }
  0x2d   : > { %p1873_p1 = scmp.ne.s32.totalorder %s2192_s30, %s1872_s26  ;;  %s1877_s17 = sshll.u32 %s2047_s16, 4  ;;  %s1878_s17 = int_to_ptr.vmem [resolvable:$false] %s1877_s17 }
  0x2e   : > { %s1879_s15 = scalar_lea.vmem %s1878_s17, 1920  ;;  %p1880_p11 = scmp.lt.s32.totalorder %s2192_s30, %s1878_s17 }
  0x2f   : > { %p1875_p3 = pnand %p1873_p1, %p1859_p2  ;;  %p1881_p5 = scmp.lt.s32.totalorder %s1879_s15, %s1872_s26 }
  0x31   : > { %p1876_p12 = pneg %p1875_p3  ;;  %p1882_p7 = por %p1881_p5, %p1880_p11 }
  0x33   : > { %p1883_p8 = pnand %p1882_p7, %p1876_p12 }
  0x35   : > { %1886 = shalt.err (!%p1883_p8)
}
  0x36   : > { %s2048_s27 = smov 384   ;;  %s2049_s19 = smov 192  }
  0x37   : > { %s2050_s20 = smov 12   ;;  %p434_p9 = scmp.lt.s32.totalorder %s2045_s24, 3 }
  0x38   : > { %1750 = dma.hbm_to_vmem [thread:$0]  (!%p2188_p13), %s2186_s28, 960, %s2192_s30, %s2195_s23, %s2048_s27, %s2049_s19, %s2050_s20  }
  0x39   : > { %p2579_p0 = scmp.ge.s32.totalorder %s2045_s24, 1 }
  0x3b   : > { %p435_p2 = pnand %p2579_p0, %p434_p9 }
  0x3c   : > { %s2227_s18 = sand.u32 (!%p435_p2), 1, %s2037_s22  }
  0x3d   : > { %438 = sbr.rel (%p435_p2) target bundleno = 958 (0x3be), region = 56  ;;  %s441_s16 = scalar_lea.sflag (!%p435_p2), [#allocation3], %s2227_s18 }
  0x3e   : > { %s1721_s26 = smul.u32 (!%p435_p2), 60, %s2227_s18 }
  0x40   : > { %s444_s17 = scalar_lea.vmem (!%p435_p2), [#allocation2], %s1721_s26 }
  0x44   : > { %2016 = dma.done.wait (%p2164_p6), %s441_s16, 960  }
  0x45   : > { %2018 = vsyncadd (%p2164_p6), %s441_s16, 4294966336  ;;  %v2051_v0 = vmov 0   ;;  %v1808_v1 = vld [vmem:[%s444_s17 + $0x4] ss:$12 sps:$4 sm:$0xff]   ;;  %v1810_v2 = vld [vmem:[%s444_s17 + $0x8] ss:$12 sps:$4 sm:$0xff]  }
  0x46   : > { %678 = vmatprep.mubr.bf16.mxu0 %v2051_v0  ;;  %1806 = vset.pattern.permute.xlu0 %v2051_v0  ;;  %v1811_v3 = vld [vmem:[%s444_s17] ss:$12 sps:$4 sm:$0xff]   ;;  %v1812_v4 = vld [vmem:[%s444_s17 + $0x1c] ss:$12 sps:$4 sm:$0xff]   ;;  %v1815_v6 = vld [vmem:[%s444_s17 + $0x18] ss:$12 sps:$4 sm:$0xff]  }
  0x47   : > { %1807 = vset.pattern.permute.xlu1 %v2051_v0  ;;  %646 = vmatprep.subr.bf16.mxu0 %v1808_v1  ;;  %v1814_v5 = vld [vmem:[%s444_s17 + $0x20] ss:$12 sps:$4 sm:$0xff]   ;;  %v553_v7 = vld [vmem:[%s444_s17 + $0x30] sm:$0xff]  ;;  %v1817_v9 = vld [vmem:[%s444_s17 + $0x38] ss:$0 sps:$4 sm:$0xff]   ;;  %vm636_vm0 = vcmask 1043456  }
  0x48   : > { %1684 = vmatprep.subr.bf16.mxu1 %v1810_v2  ;;  %647 = vmatpush1.bf16.msra.mxu0 %v1811_v3  ;;  %v1648_v8 = vcombine.high %v553_v7, %v553_v7  ;;  %v1647_v10 = vcombine.low %v553_v7, %v553_v7  ;;  %s2580_s1 = sld [smem:[#allocation20_spill]]  ;;  %vm629_vm1 = vcmask 326656   ;;  %s2581_s2 = sld [smem:[#allocation21_spill]]  ;;  %v644_v15 = vsel %vm636_vm0, %v1817_v9, 0  ;;  %v761_v19 = vld [vmem:[%s2550_s4] sm:$0xff] }
  0x49   : > { %1685 = vmatpush3.bf16.msra.mxu1 %v1810_v2  ;;  %648 = vmatprep.subr.bf16.mxu0 %v1812_v4  ;;  %v2052_v20 = vmov 0.0|0.0   ;;  %vm2053_vm2 = vmmov 0   ;;  %v2054_v21 = vmov 0.0   ;;  %v760_v2 = vld [vmem:[%s2549_s3] sm:$0xff]  ;;  %vm767_vm3 = vcmask 261120   ;;  %s517_s29 = smul.u32 3, %s2146_s25 }
  0x4a   : > { %1686 = vmatprep.subr.bf16.mxu1 %v1814_v5  ;;  %v638_v14 = vsel %vm636_vm0, %v1647_v10, 0  ;;  %vm1131_vm4 = vcmask 1040384   ;;  %s2331_s13 = smul.u32 3, %s2227_s18  ;;  %vm1346_vm6 = vcmask 1041408   ;;  %vm1348_vm7 = vcmask 1042432   ;;  %p2584_p12 = scmp.ne.s32.totalorder %s2574_s14, 0 }
  0x4b   : > { %p518_p6 = scmp.lt.s32.totalorder %s517_s29, 5  ;;  %vm1351_vm8 = vcmask 1044480   ;;  %vm1353_vm9 = vcmask 1045504   ;;  %vm1355_vm10 = vcmask 1046528  }
  0x4c   : > { %649 = vmatpush1.bf16.msra.mxu0 %v1815_v6  ;;  %s501_s28 = scalar_lea.vmem [#allocation6], %s2331_s13  ;;  %s2566_s15 = scalar_lea.vmem [#allocation5], %s2331_s13 }
  0x4d   : > { %1687 = vmatpush3.bf16.msra.mxu1 %v1814_v5  ;;  %1650 = vmatprep.subr.msk.bf16.mxu0 %vm636_vm0, %v1648_v8  ;;  %v967_v5 = vlaneseq  ;;  %s2597_s29 = smov (!%p518_p6, %s517_s29), 5 }
  0x4e   : > { %v1819_v11 = vld [vmem:[%s2580_s1] sm:$0xff]   ;;  %v557_v13 = vld [vmem:[%s2581_s2 + $0x10] sm:$0xff]  ;;  %1719 = vmatprep.subr.msk.bf16.mxu1 %vm636_vm0, %v1817_v9  ;;  %v1820_v16 = vld [vmem:[%s2580_s1 + $0x8] sm:$0xff]   ;;  %s525_s19 = scalar_lea.vmem %s2552_s6, %s2597_s29  ;;  %s535_s16 = scalar_lea.vmem %s2554_s8, %s2597_s29 }
  0x4f   : > { %v555_v12 = vld [vmem:[%s2581_s2] sm:$0xff]  ;;  %1690 = vmatprep.mubr.msk.bf16.mxu1 %vm629_vm1, %v1819_v11  ;;  %v556_v17 = vld [vmem:[%s2581_s2 + $0x8] sm:$0xff]  ;;  %571 = vperm.xlu1 %1807, %v557_v13   ;;  %v558_v18 = vld [vmem:[%s2581_s2 + $0x18] sm:$0xff]  ;;  %v968_v6 = vshrl.u32 %v967_v5, 7  ;;  %s530_s30 = scalar_lea.vmem %s2553_s7, %s2597_s29  ;;  %vm2338_vm5 = vcmp.lt.s32.totalorder %v967_v5, 384  ;;  %s520_s20 = scalar_lea.vmem %s2551_s5, %s2597_s29 }
  0x50   : > { %561 = vperm.xlu0 %1806, %v555_v12   ;;  %651 = vmatpush1.bf16.msra.mxu0 %v638_v14  ;;  %v2281_v10 = vld [vmem:[%s525_s19] sm:$0x7]  ;;  %s2565_s29 = scalar_lea.vmem [#allocation8], %s2331_s13 }
  0x51   : > { %1689 = vmatpush3.bf16.msra.mxu1 %v644_v15  ;;  %1713 = vmatprep.subr.bf16.mxu0 %v2052_v20  ;;  %v2275_v7 = vsub.s32 0, %v968_v6  ;;  %v2277_v8 = vsub.s32 1, %v968_v6  ;;  %v2279_v9 = vsub.s32 2, %v968_v6 }
  0x53   : > { %1651 = vmatmul.mubr.msk.bf16.vlgmr.msra.gmra.mrb[0].mxu0 %vm629_vm1, %v1819_v11  ;;  %576 = vperm.xlu1 %1807, %v558_v18   ;;  %v2285_v11 = vrot.slane %v2281_v10, %v2275_v7  ;;  %v2289_v12 = vrot.slane %v2281_v10, %v2277_v8  ;;  %v2293_v13 = vrot.slane %v2281_v10, %v2279_v9 }
  0x54   : > { %566 = vperm.xlu0 %1806, %v556_v17   ;;  %1691 = vmatmul.mubr.msk.bf16.vlgmr.msra.gmra.mrb[0].mxu1 %vm629_vm1, %v1820_v16 }
  0x55   : > { %688 = vmatprep.mubr.bf16.mxu0 %v2051_v0  ;;  %835 = vmatprep.mubr.f32.mxu1 %v2054_v21  ;;  %v1163_v14 = vsel %vm1131_vm4, %v2285_v11, 0.0  ;;  %v1164_v15 = vsel %vm1131_vm4, %v2289_v12, 0.0 }
  0x56   : > { %v1165_v17 = vadd.f32 %v1164_v15, %v1163_v14 }
  0x58   : > { %764 = vperm.xlu0 %1806, %v761_v19   ;;  %v1033_v19 = vld [vmem:[%s535_s16] sm:$0x7] }
  0x5b   : > { %1652 = vmatmul.mubr.msk.bf16.gmra.mrb[4].mxu0 %vm629_vm1, %v1820_v16  ;;  %v1166_v16 = vsel %vm1131_vm4, %v2293_v13, 0.0 }
  0x5c   : > { %1702 = vmatprep.mubr.msk.f32.mxu0 %vm2053_vm2, %v2054_v21  ;;  %v1167_v18 = vadd.f32 %v1166_v16, %v1165_v17  ;;  %v2309_v21 = vrot.slane %v1033_v19, %v2277_v8 }
  0x77   : > { %1168 = vadd.xlane.f32.xlu0 %v1167_v18 }
  0xce   : > { %v572_v23 = vpop.permute.xlu1 %571 }
  0xcf   : > { %v562_v22 = vpop.permute.xlu0 %561 }
  0xd2   : > { %v577_v25 = vpop.permute.xlu1 %576 }
  0xd3   : > { %v567_v24 = vpop.permute.xlu0 %566 }
 0x126   : > { %v680_v26 = vpop.f32.mrb[0].mxu0 }
 0x127   : > { %v1692_v27 = vpop.f32.mrb[0].mxu1  ;;  %v681_v28 = vadd.f32 %v680_v26, %v562_v22  ;;  %v682_v30 = vpop.f32.mrb[1].mxu0 }
 0x128   : > { %v742_v29 = vadd.f32 %v1692_v27, %v572_v23  ;;  %v733_v31 = vpop.f32.mrb[1].mxu1  ;;  %v683_v32 = vadd.f32 %v682_v30, %v562_v22  ;;  %v684_v34 = vpop.f32.mrb[2].mxu0 }
 0x129   : > { %v734_v33 = vadd.f32 %v733_v31, %v562_v22  ;;  %v1693_v35 = vpop.f32.mrb[2].mxu1  ;;  %v685_v37 = vadd.f32 %v684_v34, %v567_v24  ;;  %v686_v39 = vpop.f32.mrb[3].mxu0  ;;  %v748_v44 = vmax.f32 %v681_v28, 0.0  ;;  %v1212_v22 = vrot.slane %v1033_v19, %v2279_v9 }
 0x12a   : > { %v756_v36 = vmax.f32 %v742_v29, 0.0  ;;  %v745_v38 = vadd.f32 %v1693_v35, %v577_v25  ;;  %v736_v40 = vpop.f32.mrb[3].mxu1  ;;  %v687_v42 = vadd.f32 %v686_v39, %v567_v24  ;;  %v749_v47 = vmax.f32 %v683_v32, 0.0  ;;  %v765_v28 = vpop.permute.xlu0 %764 }
 0x12b   : > { %v750_v41 = vmax.f32 %v734_v33, 0.0  ;;  %v737_v43 = vadd.f32 %v736_v40, %v567_v24  ;;  %v751_v45 = vmax.f32 %v685_v37, 0.0  ;;  %v1244_v24 = vsel %vm1131_vm4, %v2309_v21, 0.0 }
 0x12c   : > { %v759_v46 = vmax.f32 %v745_v38, 0.0  ;;  %v752_v48 = vmax.f32 %v687_v42, 0.0 }
 0x12d   : > { %v753_v49 = vmax.f32 %v737_v43, 0.0  ;;  %v1707_v50 = vpack.c.bf16 %v751_v45, %v748_v44 }
 0x12e   : > { %v1717_v51 = vpack.c.bf16 %v759_v46, %v756_v36  ;;  %v1705_v52 = vpack.c.bf16 %v752_v48, %v749_v47  ;;  %v690_v54 = vpop.f32.mrb[4].mxu0  ;;  %v1032_v48 = vld [vmem:[%s530_s30] sm:$0x7] }
 0x12f   : > { %v1714_v53 = vpack.c.bf16 %v753_v49, %v750_v41  ;;  %v691_v55 = vadd.f32 %v690_v54, %v572_v23  ;;  %v692_v56 = vpop.f32.mrb[5].mxu0  ;;  %v2055_v41 = vmov 1966171168  }
 0x130   : > { %v693_v57 = vadd.f32 %v692_v56, %v572_v23  ;;  %v694_v58 = vpop.f32.mrb[6].mxu0  ;;  %1706 = vmatprep.subr.bf16.mxu1 %v1705_v52  ;;  %v965_v42 = vunpack.c.l.s4 %v2055_v41  ;;  %v1182_v56 = vrot.slane %v1032_v48, %v2275_v7 }
 0x131   : > { %1715 = vmatpush3.bf16.msra.mxu0 %v1714_v53  ;;  %v695_v59 = vadd.f32 %v694_v58, %v577_v25  ;;  %v696_v60 = vpop.f32.mrb[7].mxu0  ;;  %1708 = vmatpush1.bf16.msra.mxu1 %v1707_v50  ;;  %v754_v62 = vmax.f32 %v691_v55, 0.0  ;;  %v1190_v50 = vrot.slane %v1032_v48, %v2279_v9 }
 0x132   : > { %1716 = vmatprep.subr.bf16.mxu0 %v2052_v20  ;;  %v697_v61 = vadd.f32 %v696_v60, %v577_v25  ;;  %v755_v0 = vmax.f32 %v693_v57, 0.0  ;;  %v2306_v20 = vrot.slane %v1033_v19, %v2275_v7  ;;  %v1246_v25 = vsel %vm1131_vm4, %v1212_v22, 0.0 }
 0x133   : > { %v757_v63 = vmax.f32 %v695_v59, 0.0  ;;  %v966_v46 = vunpack.c.0.s8 %v965_v42  ;;  %v1186_v57 = vrot.slane %v1032_v48, %v2277_v8 }
 0x134   : > { %v758_v1 = vmax.f32 %v697_v61, 0.0  ;;  %v1243_v23 = vsel %vm1131_vm4, %v2306_v20, 0.0 }
 0x135   : > { %1718 = vmatpush3.bf16.msra.mxu0 %v1717_v51  ;;  %v1711_v3 = vpack.c.bf16 %v757_v63, %v754_v62  ;;  %v1245_v26 = vadd.f32 %v1244_v24, %v1243_v23  ;;  %v2321_v49 = vsub.s32 %v966_v46, %v968_v6 }
 0x136   : > { %v1709_v4 = vpack.c.bf16 %v758_v1, %v755_v0 }
 0x137   : > { %v1247_v27 = vadd.f32 %v1246_v25, %v1245_v26 }
 0x138   : > { %1703 = vmatmul.mubr.msk.f32.vlgmr.msra.gmra.mrb[8].mxu0 %vm767_vm3, %v760_v2  ;;  %1710 = vmatprep.subr.bf16.mxu1 %v1709_v4 }
 0x139   : > { %1712 = vmatpush1.bf16.msra.mxu1 %v1711_v3  ;;  %1248 = vadd.xlane.f32.xlu1 %v1247_v27 }
 0x13c   : > { %1655 = vmatmul.mubr.msk.f32.vlgmr.msra.gmra.mrb[4].mxu1 %vm767_vm3, %v760_v2 }
 0x20b   : > { %v908_v29 = vpop.f32.mrb[8].mxu0 }
 0x20c   : > { %v909_v30 = vadd.f32 %v908_v29, %v765_v28  ;;  %v1704_v31 = vpop.f32.mrb[9].mxu0 }
 0x20e   : > { %v1659_v32 = vmul.f32 -1.442695, %v909_v30 }
 0x20f   : > { %v837_v33 = vpop.f32.mrb[4].mxu1 }
 0x210   : > { %1821 = vpow2.f32 %v1659_v32  ;;  %v838_v34 = vadd.f32 %v837_v33, %v765_v28  ;;  %v839_v35 = vpop.f32.mrb[5].mxu1 }
 0x211   : > { %v840_v36 = vadd.f32 %v839_v35, %v765_v28 }
 0x212   : > { %v1657_v37 = vmul.f32 -1.442695, %v838_v34 }
 0x213   : > { %v1658_v38 = vmul.f32 -1.442695, %v840_v36 }
 0x214   : > { %1823 = vpow2.f32 %v1657_v37 }
 0x215   : > { %1825 = vpow2.f32 %v1658_v38 }
 0x21a   : > { %v1822_v39 = vpop.eup %1821 }
 0x21b   : > { %v923_v40 = vadd.f32 1.0, %v1822_v39 }
 0x21d   : > { %1827 = vrcp.f32 %v923_v40 }
 0x21e   : > { %v1824_v43 = vpop.eup %1823 }
 0x21f   : > { %v1826_v44 = vpop.eup %1825  ;;  %v921_v45 = vadd.f32 1.0, %v1824_v43 }
 0x220   : > { %v922_v47 = vadd.f32 1.0, %v1826_v44 }
 0x221   : > { %1829 = vrcp.f32 %v921_v45 }
 0x222   : > { %1831 = vrcp.f32 %v922_v47 }
 0x227   : > { %v1828_v51 = vpop.eup %1827 }
 0x228   : > { %v1196_v52 = vsub.f32 %v1828_v51, %v1190_v50  ;;  %v935_v53 = vrot.slane %v1828_v51, 1  ;;  %v1036_v54 = vmax.f32 %v1828_v51, 1e-06  ;;  %v977_v55 = vrot.slane %v1828_v51, %v2321_v49 }
 0x22a   : > { %v1199_v58 = vand.u32 2147483647, %v1196_v52  ;;  %v941_v59 = vsub.f32 %v1828_v51, %v935_v53  ;;  %v1039_v60 = vmin.f32 %v1036_v54, 0.999999 }
 0x22b   : > { %v1830_v61 = vpop.eup %1829 }
 0x22c   : > { %v1218_v62 = vmul.f32 %v1212_v22, %v1199_v58  ;;  %v1662_v63 = vmul.f32 -50.0, %v941_v59  ;;  %1833 = vlog2.f32 %v1039_v60  ;;  %v1832_v0 = vpop.eup %1831  ;;  %v1194_v1 = vsub.f32 %v1830_v61, %v1182_v56 }
 0x22d   : > { %v933_v2 = vrot.slane %v1830_v61, 1  ;;  %v1034_v3 = vmax.f32 %v1830_v61, 1e-06  ;;  %v1195_v4 = vsub.f32 %v1832_v0, %v1186_v57  ;;  %v934_v6 = vrot.slane %v1832_v0, 1 }
 0x22e   : > { %v952_v14 = vmul.f32 1.442695, %v1662_v63  ;;  %v1077_v15 = vsub.f32 1.0, %v1039_v60  ;;  %v1197_v16 = vand.u32 2147483647, %v1194_v1  ;;  %v1224_v24 = vrot.slane %v1218_v62, 1 }
 0x22f   : > { %v939_v17 = vsub.f32 %v1830_v61, %v933_v2  ;;  %v1035_v18 = vmax.f32 %v1832_v0, 1e-06  ;;  %v1037_v19 = vmin.f32 %v1034_v3, 0.999999  ;;  %v1198_v23 = vand.u32 2147483647, %v1195_v4 }
 0x230   : > { %v940_v25 = vsub.f32 %v1832_v0, %v934_v6  ;;  %1835 = vpow2.f32 %v952_v14  ;;  %v1216_v22 = vmul.f32 %v2306_v20, %v1197_v16  ;;  %v963_v36 = vcombine.low %v1830_v61, %v1832_v0  ;;  %v1030_v2 = vld [vmem:[%s520_s20] sm:$0x7]  ;;  %s1368_s20 = sand.u32 1, %s2146_s25  }
 0x231   : > { %v1660_v26 = vmul.f32 -50.0, %v939_v17  ;;  %v1038_v27 = vmin.f32 %v1035_v18, 0.999999  ;;  %1837 = vlog2.f32 %v1037_v19  ;;  %v1217_v28 = vmul.f32 %v2309_v21, %v1198_v23 }
 0x232   : > { %v1661_v29 = vmul.f32 -50.0, %v940_v25  ;;  %v1075_v30 = vsub.f32 1.0, %v1037_v19  ;;  %1839 = vlog2.f32 %v1077_v15  ;;  %v1222_v31 = vrot.slane %v1216_v22, 1 }
 0x233   : > { %v948_v32 = vmul.f32 1.442695, %v1660_v26  ;;  %1841 = vlog2.f32 %v1038_v27  ;;  %v1076_v33 = vsub.f32 1.0, %v1038_v27  ;;  %v1223_v34 = vrot.slane %v1217_v28, 1 }
 0x234   : > { %v950_v35 = vmul.f32 1.442695, %v1661_v29  ;;  %1843 = vlog2.f32 %v1075_v30  ;;  %v1228_v37 = vsel %vm1131_vm4, %v1222_v31, 0.0  ;;  %v970_v21 = vrot.slane %v963_v36, %v2321_v49 }
 0x235   : > { %1845 = vpow2.f32 %v948_v32  ;;  %v1229_v38 = vsel %vm1131_vm4, %v1223_v34, 0.0  ;;  %v1231_v41 = vsel %vm1131_vm4, %v1224_v24, 0.0  ;;  %v1270_v6 = vrot.slane %v1030_v2, %v2279_v9 }
 0x236   : > { %v1834_v20 = vpop.eup %1833  ;;  %1847 = vpow2.f32 %v950_v35  ;;  %v1230_v39 = vadd.f32 %v1229_v38, %v1228_v37  ;;  %v992_v42 = vcombine.high %v970_v21, %v977_v55  ;;  %v978_v43 = vcombine.low %v970_v21, %v977_v55 }
 0x237   : > { %v1045_v40 = vmul.f32 0.6931472, %v1834_v20  ;;  %1849 = vlog2.f32 %v1076_v33  ;;  %v1313_v16 = vmul.f32 %v2281_v10, %v1030_v2  ;;  %v1074_v25 = vsub.f32 1.0, %v1030_v2 }
 0x238   : > { %v1232_v44 = vadd.f32 %v1231_v41, %v1230_v39  ;;  %v999_v48 = vrot.slane %v992_v42, %v2321_v49  ;;  %v985_v50 = vrot.slane %v978_v43, %v2321_v49  ;;  %v1262_v26 = vrot.slane %v1030_v2, %v2275_v7 }
 0x239   : > { %v1063_v45 = vrot.slane %v1045_v40, %v2321_v49  ;;  %v1318_v27 = vrot.slane %v1313_v16, %v2275_v7  ;;  %v1266_v29 = vrot.slane %v1030_v2, %v2277_v8  ;;  %v1322_v31 = vrot.slane %v1313_v16, %v2277_v8 }
 0x23a   : > { %v1836_v47 = vpop.eup %1835  ;;  %1233 = vadd.xlane.f32.xlu0 %v1232_v44  ;;  %1001 = vst.msk [vmem:[%s501_s28] sm:$0x7] %vm2338_vm5, %v999_v48  ;;  %991 = vst.msk [vmem:[%s2566_s15] sm:$0x7] %vm2338_vm5, %v985_v50  ;;  %v1326_v36 = vrot.slane %v1313_v16, %v2279_v9 }
 0x23b   : > { %v1838_v51 = vpop.eup %1837  ;;  %v956_v52 = vadd.f32 1.0, %v1836_v47  ;;  %v1330_v37 = vsel %vm1131_vm4, %v1318_v27, 0.0  ;;  %v1331_v42 = vsel %vm1131_vm4, %v1322_v31, 0.0 }
 0x23c   : > { %v1840_v53 = vpop.eup %1839  ;;  %v1041_v54 = vmul.f32 0.6931472, %v1838_v51 }
 0x23d   : > { %v1842_v5 = vpop.eup %1841  ;;  %1851 = vrcp.f32 %v956_v52  ;;  %v1083_v55 = vmul.f32 0.6931472, %v1840_v53 }
 0x23e   : > { %v1844_v56 = vpop.eup %1843  ;;  %v1043_v57 = vmul.f32 0.6931472, %v1842_v5  ;;  %v1332_v5 = vadd.f32 %v1331_v42, %v1330_v37 }
 0x23f   : > { %v1846_v58 = vpop.eup %1845  ;;  %v1101_v59 = vrot.slane %v1083_v55, %v2321_v49  ;;  %v1079_v63 = vmul.f32 0.6931472, %v1844_v56 }
 0x240   : > { %v1848_v60 = vpop.eup %1847  ;;  %v954_v61 = vadd.f32 1.0, %v1846_v58  ;;  %v1049_v62 = vcombine.low %v1041_v54, %v1043_v57 }
 0x241   : > { %v1850_v0 = vpop.eup %1849  ;;  %v955_v1 = vadd.f32 1.0, %v1848_v60 }
 0x242   : > { %1853 = vrcp.f32 %v954_v61  ;;  %v1056_v3 = vrot.slane %v1049_v62, %v2321_v49  ;;  %v1081_v4 = vmul.f32 0.6931472, %v1850_v0 }
 0x243   : > { %1855 = vrcp.f32 %v955_v1 }
 0x244   : > { %v1064_v14 = vcombine.low %v1056_v3, %v1063_v45  ;;  %v1087_v15 = vcombine.low %v1079_v63, %v1081_v4  ;;  %v1249_v3 = vpop.xlane.xlu1 %1248 }
 0x246   : > { %v1071_v17 = vrot.slane %v1064_v14, %v2321_v49  ;;  %v1094_v18 = vrot.slane %v1087_v15, %v2321_v49  ;;  %v1250_v14 = vrot.slane %v1249_v3, 4 }
 0x247   : > { %v1852_v19 = vpop.eup %1851 }
 0x248   : > { %v1276_v23 = vmul.f32 %v1852_v19, %v1270_v6  ;;  %v1073_v24 = vmul.f32 %v1071_v17, %v1030_v2  ;;  %v1102_v22 = vcombine.low %v1094_v18, %v1101_v59  ;;  %v1019_v28 = vrot.slane %v1852_v19, %v2321_v49 }
 0x249   : > { %v1297_v40 = vmul.f32 %v1852_v19, %v2293_v13  ;;  %v1251_v19 = vadd.f32 %v1250_v14, %v1249_v3 }
 0x24a   : > { %v1109_v30 = vrot.slane %v1102_v22, %v2321_v49  ;;  %v1279_v47 = vmul.f32 %v1276_v23, %v2293_v13 }
 0x24b   : > { %v1301_v55 = vsel %vm1131_vm4, %v1297_v40, 0.0 }
 0x24c   : > { %v1854_v32 = vpop.eup %1853  ;;  %v1111_v33 = vmul.f32 %v1109_v30, %v1074_v25  ;;  %v1283_v58 = vsel %vm1131_vm4, %v1279_v47, 0.0 }
 0x24d   : > { %v1856_v34 = vpop.eup %1855  ;;  %v1274_v35 = vmul.f32 %v1854_v32, %v1262_v26  ;;  %v1295_v20 = vmul.f32 %v1854_v32, %v2285_v11 }
 0x24e   : > { %v1275_v38 = vmul.f32 %v1856_v34, %v1266_v29  ;;  %v1112_v21 = vadd.f32 %v1111_v33, %v1073_v24  ;;  %v1296_v39 = vmul.f32 %v1856_v34, %v2289_v12  ;;  %v1005_v44 = vcombine.low %v1854_v32, %v1856_v34 }
 0x24f   : > { %v1277_v41 = vmul.f32 %v1274_v35, %v2285_v11  ;;  %v1298_v43 = vsel %vm1131_vm4, %v1295_v20, 0.0  ;;  %v1252_v29 = vrot.slane %v1251_v19, 2 }
 0x250   : > { %v1278_v45 = vmul.f32 %v1275_v38, %v2289_v12  ;;  %v1113_v48 = vsub.f32 0.0, %v1112_v21  ;;  %v1299_v50 = vsel %vm1131_vm4, %v1296_v39, 0.0  ;;  %v1012_v53 = vrot.slane %v1005_v44, %v2321_v49 }
 0x251   : > { %v1280_v51 = vsel %vm1131_vm4, %v1277_v41, 0.0  ;;  %v1300_v52 = vadd.f32 %v1299_v50, %v1298_v43  ;;  %v1333_v12 = vsel %vm1131_vm4, %v1326_v36, 0.0  ;;  %v1253_v38 = vadd.f32 %v1252_v29, %v1251_v19 }
 0x252   : > { %v1281_v54 = vsel %vm1131_vm4, %v1278_v45, 0.0  ;;  %v1114_v11 = vmul.f32 %v1113_v48, %v2281_v10  ;;  %v1020_v57 = vcombine.low %v1012_v53, %v1019_v28  ;;  %v1334_v2 = vadd.f32 %v1333_v12, %v1332_v5 }
 0x253   : > { %v1282_v56 = vadd.f32 %v1281_v54, %v1280_v51  ;;  %v1302_v13 = vadd.f32 %v1301_v55, %v1300_v52  ;;  %v1254_v47 = vrot.slane %v1253_v38, 1 }
 0x254   : > { %v1119_v59 = vrot.slane %v1114_v11, %v2275_v7  ;;  %v1123_v60 = vrot.slane %v1114_v11, %v2277_v8  ;;  %v1127_v61 = vrot.slane %v1114_v11, %v2279_v9  ;;  %v1027_v10 = vrot.slane %v1020_v57, %v2321_v49  ;;  %v1169_v9 = vpop.xlane.xlu0 %1168 }
 0x255   : > { %v1284_v62 = vadd.f32 %v1283_v58, %v1282_v56  ;;  %v1170_v4 = vrot.slane %v1169_v9, 4  ;;  %v1255_v5 = vadd.f32 %v1254_v47, %v1253_v38 }
 0x256   : > { %v1132_v63 = vsel %vm1131_vm4, %v1119_v59, 0.0  ;;  %v1133_v0 = vsel %vm1131_vm4, %v1123_v60, 0.0  ;;  %1029 = vst.msk [vmem:[%s2565_s29] sm:$0x7] %vm2338_vm5, %v1027_v10  ;;  %v1135_v7 = vsel %vm1131_vm4, %v1127_v61, 0.0 }
 0x257   : > { %1285 = vadd.xlane.f32.xlu0 %v1284_v62  ;;  %v1134_v1 = vadd.f32 %v1133_v0, %v1132_v63  ;;  %v1171_v15 = vadd.f32 %v1170_v4, %v1169_v9 }
 0x259   : > { %v1136_v8 = vadd.f32 %v1135_v7, %v1134_v1  ;;  %v1172_v23 = vrot.slane %v1171_v15, 2 }
 0x25b   : > { %1137 = vadd.xlane.f32.xlu1 %v1136_v8  ;;  %1335 = vadd.xlane.f32.xlu0 %v1334_v2  ;;  %v1173_v33 = vadd.f32 %v1172_v23, %v1171_v15 }
 0x25d   : > { %v1174_v41 = vrot.slane %v1173_v33, 1 }
 0x25f   : > { %1303 = vadd.xlane.f32.xlu1 %v1302_v13  ;;  %v1175_v52 = vadd.f32 %v1174_v41, %v1173_v33 }
 0x2c7   : > { %v1234_v49 = vpop.xlane.xlu0 %1233 }
 0x2c8   : > { %v1235_v6 = vrot.slane %v1234_v49, 4 }
 0x2ca   : > { %v1236_v16 = vadd.f32 %v1235_v6, %v1234_v49 }
 0x2cc   : > { %v1237_v24 = vrot.slane %v1236_v16, 2 }
 0x2ce   : > { %v1238_v34 = vadd.f32 %v1237_v24, %v1236_v16 }
 0x2d0   : > { %v1239_v44 = vrot.slane %v1238_v34, 1 }
 0x2d2   : > { %v1240_v53 = vadd.f32 %v1239_v44, %v1238_v34 }
 0x2e4   : > { %v1286_v17 = vpop.xlane.xlu0 %1285 }
 0x2e5   : > { %v1287_v18 = vrot.slane %v1286_v17, 4 }
 0x2e7   : > { %v1288_v46 = vadd.f32 %v1287_v18, %v1286_v17 }
 0x2e8   : > { %v1138_v25 = vpop.xlane.xlu1 %1137  ;;  %v1336_v22 = vpop.xlane.xlu0 %1335 }
 0x2e9   : > { %v1289_v26 = vrot.slane %v1288_v46, 2  ;;  %v1139_v27 = vrot.slane %v1138_v25, 4  ;;  %v1337_v28 = vrot.slane %v1336_v22, 4 }
 0x2eb   : > { %v1140_v30 = vadd.f32 %v1139_v27, %v1138_v25  ;;  %v1338_v31 = vadd.f32 %v1337_v28, %v1336_v22  ;;  %v1290_v20 = vadd.f32 %v1289_v26, %v1288_v46 }
 0x2ec   : > { %v1304_v32 = vpop.xlane.xlu1 %1303 }
 0x2ed   : > { %v1141_v35 = vrot.slane %v1140_v30, 2  ;;  %v1339_v36 = vrot.slane %v1338_v31, 2  ;;  %v1305_v37 = vrot.slane %v1304_v32, 4  ;;  %v1291_v45 = vrot.slane %v1290_v20, 1 }
 0x2ef   : > { %v1340_v21 = vadd.f32 %v1339_v36, %v1338_v31  ;;  %v1306_v39 = vadd.f32 %v1305_v37, %v1304_v32  ;;  %v1142_v40 = vadd.f32 %v1141_v35, %v1140_v30  ;;  %v1292_v54 = vadd.f32 %v1291_v45, %v1290_v20 }
 0x2f1   : > { %v1307_v42 = vrot.slane %v1306_v39, 2  ;;  %v1143_v43 = vrot.slane %v1142_v40, 1  ;;  %v1341_v51 = vrot.slane %v1340_v21, 1 }
 0x2f3   : > { %v1144_v48 = vadd.f32 %v1143_v43, %v1142_v40  ;;  %v1308_v50 = vadd.f32 %v1307_v42, %v1306_v39  ;;  %v1342_v56 = vadd.f32 %v1341_v51, %v1340_v21 }
 0x2f5   : > { %1723 = vpush %v1144_v48  ;;  %v1309_v11 = vrot.slane %v1308_v50, 1 }
 0x2f6   : > { %1725 = vpush %v1175_v52 }
 0x2f7   : > { %1727 = vpush %v1240_v53  ;;  %v1310_v55 = vadd.f32 %v1309_v11, %v1308_v50 }
 0x2f8   : > { %1729 = vpush %v1255_v5 }
 0x2f9   : > { %1731 = vpush %v1292_v54 }
 0x2fa   : > { %1733 = vpush %v1310_v55 }
 0x2fb   : > { %1735 = vpush %v1342_v56 }
 0x326   : > { %s1724_s26 = spop %1723 }
 0x327   : > { %v1146_v12 = vstv %s1724_s26  ;;  %s1726_s16 = spop %1725  ;;  %s2404_s26 = smul.u32 48, %s2146_s25 }
 0x328   : > { %v1177_v13 = vstv %s1726_s16  ;;  %s1728_s17 = spop %1727  ;;  %s1407_s16 = sshll.u32 %s501_s28, 4  ;;  %s1408_s16 = int_to_ptr.vmem [resolvable:$true] %s1407_s16 }
 0x329   : > { %v1345_v57 = vsel %vm1131_vm4, %v1146_v12, %v1177_v13  ;;  %v1242_v58 = vstv %s1728_s17  ;;  %s1730_s23 = spop %1729  ;;  %s1887_s29 = scalar_lea.vmem %s1408_s16, 48 }
 0x32a   : > { %v1347_v59 = vsel %vm1346_vm6, %v1345_v57, %v1242_v58  ;;  %v1257_v60 = vstv %s1730_s23  ;;  %s1732_s30 = spop %1731  ;;  %p1888_p11 = scmp.ne.s32.totalorder %s1408_s16, %s1887_s29 }
 0x32b   : > { %v1349_v61 = vsel %vm1348_vm7, %v1347_v59, %v1257_v60  ;;  %v1294_v62 = vstv %s1732_s30  ;;  %s1734_s27 = spop %1733  ;;  %s2412_s30 = scalar_lea.hbm %s2556_s10, %s2404_s26 }
 0x32c   : > { %v1350_v10 = vsel %vm636_vm0, %v1349_v61, %v1294_v62  ;;  %v1312_v63 = vstv %s1734_s27  ;;  %s1736_s19 = spop %1735  ;;  %s2414_s27 = scalar_lea.sflag [#allocation7], %s1368_s20 }
 0x32d   : > { %v1352_v0 = vsel %vm1351_vm8, %v1350_v10, %v1312_v63  ;;  %v1344_v1 = vstv %s1736_s19  ;;  %p1889_p13 = pnand %p1888_p11, %p2584_p12  ;;  %s2056_s19 = smov [#allocation6]  }
 0x32e   : > { %v1354_v2 = vsel %vm1353_vm9, %v1352_v0, %v1344_v1  ;;  %s1891_s15 = sshll.u32 %s2056_s19, 4  ;;  %s1892_s15 = int_to_ptr.vmem [resolvable:$false] %s1891_s15 }
 0x32f   : > { %v1356_v7 = vsel %vm1355_vm10, %v1354_v2, 0.0  ;;  %p1890_p4 = pneg %p1889_p13  ;;  %s1893_s0 = scalar_lea.vmem %s1892_s15, 96 }
 0x330   : > { %1359 = vperm.xlu1 %1807, %v1356_v7   ;;  %p1894_p10 = scmp.lt.s32.totalorder %s1408_s16, %s1892_s15  ;;  %p1895_p1 = scmp.lt.s32.totalorder %s1893_s0, %s1887_s29 }
 0x332   : > { %p1896_p3 = por %p1895_p1, %p1894_p10 }
 0x334   : > { %p1897_p5 = pnand %p1896_p3, %p1890_p4 }
 0x336   : > { %1900 = shalt.err (!%p1897_p5)
}
 0x337   : > { %s1901_s28 = scalar_lea.hbm %s2412_s30, 48  ;;  %s1905_s23 = scalar_lea.hbm %s2556_s10, 96 }
 0x338   : > { %p1902_p7 = scmp.ne.s32.totalorder %s2412_s30, %s1901_s28  ;;  %p1906_p0 = scmp.lt.u32.totalorder %s2412_s30, %s2556_s10 }
 0x339   : > { %p1907_p2 = scmp.lt.u32.totalorder %s1905_s23, %s1901_s28  ;;  %p1909_p11 = scmp.lt.u32.totalorder %s1901_s28, %s2412_s30 }
 0x33a   : > { %p1903_p8 = pnand %p1902_p7, %p2584_p12 }
 0x33b   : > { %p1908_p6 = por %p1907_p2, %p1906_p0 }
 0x33c   : > { %p1904_p9 = pneg %p1903_p8 }
 0x33d   : > { %p1910_p13 = por %p1909_p11, %p1908_p6 }
 0x33f   : > { %p1911_p4 = pnand %p1910_p13, %p1904_p9 }
 0x341   : > { %1914 = shalt.err (!%p1911_p4)
}
 0x342   : > { %1740 = dma.vmem_to_hbm [thread:$0]  (%p2584_p12), %s1408_s16, 48, %s2412_s30, %s2414_s27  }
 0x343   : > { %s2438_s20 = scalar_lea.hbm %s2555_s9, %s2404_s26  ;;  %s2585_s28 = scalar_lea.vmem [#allocation5], %s2331_s13 }
 0x344   : > { %s1393_s17 = sshll.u32 %s2585_s28, 4  ;;  %s2446_s15 = scalar_lea.hbm %s2557_s11, %s2404_s26  ;;  %s2448_s17 = int_to_ptr.vmem [resolvable:$true] %s1393_s17 }
 0x345   : > { %s2586_s1 = scalar_lea.vmem [#allocation8], %s2331_s13  ;;  %s1364_s16 = scalar_lea.sflag [#allocation4], %s2227_s18 }
 0x346   : > { %s2452_s2 = sshll.u32 %s2586_s1, 4  ;;  %s1915_s30 = scalar_lea.vmem %s2448_s17, 48  ;;  %s1422_s2 = int_to_ptr.vmem [resolvable:$true] %s2452_s2 }
 0x347   : > { %p1916_p10 = scmp.ne.s32.totalorder %s2448_s17, %s1915_s30  ;;  %s2057_s0 = smov [#allocation5]  }
 0x348   : > { %s1919_s29 = sshll.u32 %s2057_s0, 4  ;;  %s1920_s29 = int_to_ptr.vmem [resolvable:$false] %s1919_s29 }
 0x349   : > { %p1917_p1 = pnand %p1916_p10, %p2584_p12  ;;  %s1921_s28 = scalar_lea.vmem %s1920_s29, 96 }
 0x34a   : > { %p1922_p5 = scmp.lt.s32.totalorder %s2448_s17, %s1920_s29  ;;  %p1923_p7 = scmp.lt.s32.totalorder %s1921_s28, %s1915_s30 }
 0x34b   : > { %p1918_p3 = pneg %p1917_p1 }
 0x34c   : > { %p1924_p8 = por %p1923_p7, %p1922_p5 }
 0x34e   : > { %p1925_p9 = pnand %p1924_p8, %p1918_p3 }
 0x350   : > { %1928 = shalt.err (!%p1925_p9)
}
 0x351   : > { %s1929_s1 = scalar_lea.hbm %s2438_s20, 48  ;;  %s1933_s23 = scalar_lea.hbm %s2555_s9, 96 }
 0x352   : > { %p1930_p0 = scmp.ne.s32.totalorder %s2438_s20, %s1929_s1  ;;  %p1934_p11 = scmp.lt.u32.totalorder %s2438_s20, %s2555_s9 }
 0x353   : > { %p1935_p13 = scmp.lt.u32.totalorder %s1933_s23, %s1929_s1  ;;  %p1937_p10 = scmp.lt.u32.totalorder %s1929_s1, %s2438_s20 }
 0x354   : > { %p1931_p2 = pnand %p1930_p0, %p2584_p12 }
 0x355   : > { %p1936_p4 = por %p1935_p13, %p1934_p11 }
 0x356   : > { %p1932_p6 = pneg %p1931_p2 }
 0x357   : > { %p1938_p1 = por %p1937_p10, %p1936_p4 }
 0x359   : > { %p1939_p3 = pnand %p1938_p1, %p1932_p6 }
 0x35b   : > { %1942 = shalt.err (!%p1939_p3)
}
 0x35c   : > { %1739 = dma.vmem_to_hbm [thread:$0]  (%p2584_p12), %s2448_s17, 48, %s2438_s20, %s1364_s16  }
 0x35d   : > { %s1943_s30 = scalar_lea.vmem %s1422_s2, 48  ;;  %s2058_s29 = smov [#allocation8]  }
 0x35e   : > { %p1944_p5 = scmp.ne.s32.totalorder %s1422_s2, %s1943_s30  ;;  %s1947_s28 = sshll.u32 %s2058_s29, 4  ;;  %s1948_s28 = int_to_ptr.vmem [resolvable:$false] %s1947_s28 }
 0x35f   : > { %s1949_s1 = scalar_lea.vmem %s1948_s28, 96  ;;  %p1950_p9 = scmp.lt.s32.totalorder %s1422_s2, %s1948_s28 }
 0x360   : > { %p1945_p7 = pnand %p1944_p5, %p2584_p12  ;;  %p1951_p0 = scmp.lt.s32.totalorder %s1949_s1, %s1943_s30 }
 0x362   : > { %p1946_p8 = pneg %p1945_p7  ;;  %p1952_p2 = por %p1951_p0, %p1950_p9 }
 0x364   : > { %p1953_p6 = pnand %p1952_p2, %p1946_p8 }
 0x366   : > { %1956 = shalt.err (!%p1953_p6)
}
 0x367   : > { %s1957_s20 = scalar_lea.hbm %s2446_s15, 48  ;;  %s1961_s13 = scalar_lea.hbm %s2557_s11, 96 }
 0x368   : > { %p1958_p11 = scmp.ne.s32.totalorder %s2446_s15, %s1957_s20  ;;  %p1962_p10 = scmp.lt.u32.totalorder %s2446_s15, %s2557_s11 }
 0x369   : > { %p1963_p1 = scmp.lt.u32.totalorder %s1961_s13, %s1957_s20  ;;  %p1965_p5 = scmp.lt.u32.totalorder %s1957_s20, %s2446_s15 }
 0x36a   : > { %p1959_p13 = pnand %p1958_p11, %p2584_p12 }
 0x36b   : > { %p1964_p3 = por %p1963_p1, %p1962_p10 }
 0x36c   : > { %p1960_p4 = pneg %p1959_p13 }
 0x36d   : > { %p1966_p7 = por %p1965_p5, %p1964_p3 }
 0x36f   : > { %p1967_p8 = pnand %p1966_p7, %p1960_p4 }
 0x371   : > { %1970 = shalt.err (!%p1967_p8)
}
 0x372   : > { %1741 = dma.vmem_to_hbm [thread:$0]  (%p2584_p12), %s1422_s2, 48, %s2446_s15, %s2414_s27  }
 0x373   : > { %s1638_s19 = sshll.u32 %s2227_s18, 3  ;;  %s1667_s29 = sshll.u32 %s2146_s25, 7 }
 0x374   : > { %s515_s0 = scalar_lea.vmem [#allocation9], %s1638_s19  ;;  %s2502_s20 = scalar_lea.hbm %s2558_s12, %s1667_s29 }
 0x375   : > { %s1434_s30 = sshll.u32 %s515_s0, 4  ;;  %s1379_s17 = scalar_lea.sflag [#allocation10], %s2227_s18  ;;  %s2497_s30 = int_to_ptr.vmem [resolvable:$true] %s1434_s30 }
 0x376   : > { %s1971_s16 = scalar_lea.vmem %s2497_s30, 128  ;;  %s2059_s2 = smov [#allocation9]  }
 0x377   : > { %p1972_p9 = scmp.ne.s32.totalorder %s2497_s30, %s1971_s16  ;;  %s1975_s25 = sshll.u32 %s2059_s2, 4  ;;  %s1976_s25 = int_to_ptr.vmem [resolvable:$false] %s1975_s25 }
 0x378   : > { %s1977_s27 = scalar_lea.vmem %s1976_s25, 256  ;;  %p1978_p6 = scmp.lt.s32.totalorder %s2497_s30, %s1976_s25 }
 0x379   : > { %p1973_p0 = pnand %p1972_p9, %p2584_p12  ;;  %p1979_p11 = scmp.lt.s32.totalorder %s1977_s27, %s1971_s16 }
 0x37b   : > { %p1974_p2 = pneg %p1973_p0  ;;  %p1980_p13 = por %p1979_p11, %p1978_p6 }
 0x37d   : > { %p1981_p4 = pnand %p1980_p13, %p1974_p2 }
 0x3af   : > { %v1360_v8 = vpop.permute.xlu1 %1359 }
 0x3b0   : > { %1362 = vst [vmem:[%s515_s0] sm:$0xff] %v1360_v8 }
 0x3b1   : > { %1984 = shalt.err (!%p1981_p4)
}
 0x3b2   : > { %s1985_s18 = scalar_lea.hbm %s2502_s20, 128  ;;  %s1989_s26 = scalar_lea.hbm %s2558_s12, 256 }
 0x3b3   : > { %p1986_p10 = scmp.ne.s32.totalorder %s2502_s20, %s1985_s18  ;;  %p1990_p5 = scmp.lt.u32.totalorder %s2502_s20, %s2558_s12 }
 0x3b4   : > { %p1991_p7 = scmp.lt.u32.totalorder %s1989_s26, %s1985_s18  ;;  %p1993_p9 = scmp.lt.u32.totalorder %s1985_s18, %s2502_s20 }
 0x3b5   : > { %p1987_p1 = pnand %p1986_p10, %p2584_p12 }
 0x3b6   : > { %p1992_p8 = por %p1991_p7, %p1990_p5 }
 0x3b7   : > { %p1988_p3 = pneg %p1987_p1 }
 0x3b8   : > { %p1994_p0 = por %p1993_p9, %p1992_p8 }
 0x3ba   : > { %p1995_p2 = pnand %p1994_p0, %p1988_p3 }
 0x3bc   : > { %1998 = shalt.err (!%p1995_p2)
}
 0x3bd   : > { %1742 = dma.vmem_to_hbm [thread:$0]  (%p2584_p12), %s2497_s30, 128, %s2502_s20, %s1379_s17  }
 0x3be PF: > { %s2587_s0 = sld [smem:[#allocation18_spill]]  ;;  %s1446_s29 = sand.u32 1, %s2033_s21  }
 0x3bf   : > { %p2589_p11 = scmp.ge.s32.totalorder %s2045_s24, 2  ;;  %s1447_s28 = scalar_lea.sflag [#allocation4], %s1446_s29 }
 0x3c4   : > { %p2588_p6 = scmp.ne.s32.totalorder %s2587_s0, 0 }
 0x3c6   : > { %p1752_p13 = pnand %p2589_p11, %p2588_p6 }
 0x3c8   : > { %2020 = dma.done.wait (!%p1752_p13), %s1447_s28, 48  }
 0x3c9   : > { %2022 = vsyncadd (!%p1752_p13), %s1447_s28, 4294967248  ;;  %s2590_s1 = sadd.s32 4294967294, %s2045_s24  }
 0x3ca   : > { %s1455_s16 = sand.u32 1, %s2590_s1  }
 0x3cb   : > { %s1456_s2 = scalar_lea.sflag [#allocation7], %s1455_s16 }
 0x3cc   : > { %2024 = dma.done.wait (!%p1752_p13), %s1456_s2, 96  }
 0x3cd   : > { %2026 = vsyncadd (!%p1752_p13), %s1456_s2, 4294967200  ;;  %s1474_s14 = scalar_lea.sflag [#allocation10], %s1446_s29 }
 0x3ce   : > { %2028 = dma.done.wait (!%p1752_p13), %s1474_s14, 128  }
 0x3cf   : > { %2030 = vsyncadd (!%p1752_p13), %s1474_s14, 4294967168  ;;  %s2591_s24 = sld [smem:[#allocation16_spill]]  ;;  %s2592_s30 = sld [smem:[#allocation15_spill]] }
 0x3d0   : > { %s2593_s23 = sld [smem:[#allocation17_spill]]  ;;  %s2594_s21 = smov %s2037_s22 }
 0x3d5   : > { %p32_p12 = scmp.ge.s32.totalorder %s2591_s24, 4   ;;  %s2595_s22 = smov %s2592_s30 }
 0x3d7   :  { %34 = sbr.rel (!%p32_p12) target bundleno = 13 (0xd), region = 162 }
 0x3de   :  { %1479 = vsyncpa [#allocation3], 1 }
 0x3df   :  { %1481 = vsyncpa [#allocation3 + $0x1], 1 }
 0x3e0   :  { %1482 = vsyncpa [#allocation4], 1 }
 0x3e1   :  { %1484 = vsyncpa [#allocation4 + $0x1], 1 }
 0x3e2   :  { %1485 = vsyncpa [#allocation7], 1 }
 0x3e3   :  { %1487 = vsyncpa [#allocation7 + $0x1], 1 }
 0x3e4   :  { %1488 = vsyncpa [#allocation10], 1 }
 0x3e5   :  { %1490 = vsyncpa [#allocation10 + $0x1], 1 }

</bundles_post_ra>
